<compile_context>
chip_gen: v6e
topology: v6e:2x2x1
jax: 0.10.0
libtpu: 0.0.40
codegen_flags: <defaults>
</compile_context>

<pallas_src>
import jax
import jax.numpy as jnp
from jax.experimental import pallas as pl
from jax.experimental.pallas import tpu as pltpu


def gcn_net_kernel(x_ref, op_ref, bias_ref, o_ref):
    """Fused gcn_net forward for one row tile of the flattened input.

    x_ref   : (tm, V*C)   rows = (n, t), cols = (v, c_in)   -- lane-dense
    op_ref  : (V*C, V*C)  fused operator B[(v,c_in),(w,c_out)]
    bias_ref: (1, V*C)    effective bias b_eff[(w,c_out)]
    o_ref   : (tm, V*C)   rows = (n, t), cols = (w, c_out)
    """
    x = x_ref[...]
    # Single MXU matmul: contraction depth V*C = 128, output lanes = 128.
    g = jnp.dot(x, op_ref[...], preferred_element_type=jnp.float32)
    # Bias + identity residual + ReLU (all lane-dense VPU work).
    o_ref[...] = jnp.maximum(g + bias_ref[...] + x, 0.0).astype(o_ref.dtype)


def gcn_net_forward(x_nctv, A, W, b):
    """gcn_net forward.  Returns (out, A) like the PyTorch module.

    x_nctv : (N, C, T, V) float32   (PyTorch NCHW convention)
    A      : (K, V, V)    float32   adjacency stack
    W      : (K*C, C)     float32   Conv2d(C, K*C, 1x1) weight (squeezed), row = k*C + c_out
    b      : (K*C,)       float32   Conv2d bias
    """
    N, C, T, V = x_nctv.shape
    K = A.shape[0]
    NT, VC = N * T, V * C

    # ---- one-time wrapper precompute (tiny; HIGHEST precision is fine here) ----
    # x layout (N, C, T, V) -> (N, T, V, C) -> flat (N*T, V*C); cols = (v, c_in).
    x_flat = jnp.transpose(x_nctv, (0, 2, 3, 1)).reshape(NT, VC)
    # W rows are k*C + c_out -> W_k[k, c_out, c_in]
    w_k = W.reshape(K, C, C)
    # B[(v, c_in), (w, c_out)] = sum_k A[k, v, w] * W_k[c_out, c_in]
    fused_op = jnp.einsum('kvw,koc->vcwo', A, w_k,
                          precision=jax.lax.Precision.HIGHEST).reshape(VC, VC)
    # b_eff[(w, c_out)] = sum_{k, v} A[k, v, w] * b[k*C + c_out]
    b_k = b.reshape(K, C)
    b_eff = jnp.einsum('kvw,ko->wo', A, b_k,
                       precision=jax.lax.Precision.HIGHEST).reshape(1, VC)

    # At these sizes everything (x, B, b_eff, out ~ 80 KiB total) fits in VMEM,
    # so one grid step processes all N*T rows (avoids ~600-cycle per-step
    # overhead dominating the ~0.5 MFLOP of work).
    # TODO(synk): for realistic ST-GCN dims (T~300, C~256), add a row-tiling
    # grid axis over N*T (tile a multiple of 8, >=512 rows) so the per-step
    # block stays within v7x's 64 MiB VMEM while staying near HBM roofline.
    tm = NT
    grid = (pl.cdiv(NT, tm),)   # == (1,) here

    out_flat = pl.pallas_call(
        gcn_net_kernel,
        out_shape=jax.ShapeDtypeStruct((NT, VC), x_flat.dtype),
        grid_spec=pltpu.PrefetchScalarGridSpec(
            num_scalar_prefetch=0,
            grid=grid,
            in_specs=[
                pl.BlockSpec((tm, VC), lambda i: (i, 0)),   # x rows (lane-dense)
                pl.BlockSpec((VC, VC), lambda i: (0, 0)),   # fused operator B
                pl.BlockSpec((1, VC), lambda i: (0, 0)),    # effective bias
            ],
            out_specs=pl.BlockSpec((tm, VC), lambda i: (i, 0)),
        ),
        compiler_params=pltpu.CompilerParams(
            dimension_semantics=("arbitrary",)),
    )(x_flat, fused_op, b_eff)

    # Back to PyTorch layout: (N*T, V*C) -> (N, T, V, C) -> (N, C, T, V).
    out_nctv = jnp.transpose(out_flat.reshape(N, T, V, C), (0, 3, 1, 2))
    return out_nctv, A


def gcn_net_reference(x_nctv, A, W, b):
    """Pure-JAX reference mirroring the PyTorch module (identity residual)."""
    N, C, T, V = x_nctv.shape
    K = A.shape[0]
    y = jnp.einsum('oc,nctv->notv', W, x_nctv,
                   precision=jax.lax.Precision.HIGHEST) + b[None, :, None, None]
    y = y.reshape(N, K, C, T, V)
    g = jnp.einsum('nkctv,kvw->nctw', y, A,
                   precision=jax.lax.Precision.HIGHEST)
    out = jax.nn.relu(g + x_nctv)
    return out, A


if __name__ == "__main__":
    # gcn_net(in_channels=8, out_channels=8, kernel_size=(3, 3), stride=1)
    # -> residual is the identity; temporal branch (self.tcn) unused in forward.
    N, C, T, V, K = 2, 8, 8, 16, 3   # V*C = 128 (one full vreg lane row)

    key = jax.random.PRNGKey(0)
    kx, ka, kw, kb = jax.random.split(key, 4)
    x = jax.random.normal(kx, (N, C, T, V), jnp.float32)
    A = jax.random.uniform(ka, (K, V, V), jnp.float32)
    W = jax.random.normal(kw, (K * C, C), jnp.float32) / jnp.sqrt(C)
    b = jax.random.normal(kb, (K * C,), jnp.float32) * 0.1

    out, A_out = gcn_net_forward(x, A, W, b)
    jax.block_until_ready(out)

    ref, _ = gcn_net_reference(x, A, W, b)
    assert out.shape == (N, C, T, V)
    # Kernel matmul runs at default (single-pass) MXU precision; tolerance
    # chosen accordingly (errors from bf16 rounding over a 128-deep contraction).
    assert jnp.allclose(out, ref, rtol=2e-2, atol=2e-2), \
        float(jnp.max(jnp.abs(out - ref)))
    assert jnp.allclose(A_out, A)
    print("KERNEL_OK")
</pallas_src>

<mosaic_0001>
module attributes {stable_mosaic.version = 11 : i64} {
  func.func @gcn_net_kernel(%arg0: i32, %arg1: memref<16x128xf32, #tpu.memory_space<vmem>>, %arg2: memref<128x128xf32, #tpu.memory_space<vmem>>, %arg3: memref<1x128xf32, #tpu.memory_space<vmem>>, %arg4: memref<16x128xf32, #tpu.memory_space<vmem>>) attributes {dimension_semantics = [#tpu.dimension_semantics<arbitrary>], iteration_bounds = array<i64: 1>, scalar_prefetch = 0 : i64, scratch_operands = 0 : i64, tpu.core_type = #tpu.core_type<tc>, window_params = [{transform_indices = @transform_0, window_bounds = array<i64: 16, 128>}, {pipeline_mode = #tpu.pipeline_mode<synchronous>, transform_indices = @transform_1, window_bounds = array<i64: 128, 128>}, {pipeline_mode = #tpu.pipeline_mode<synchronous>, transform_indices = @transform_2, window_bounds = array<i64: 1, 128>}, {transform_indices = @transform_3, window_bounds = array<i64: 16, 128>}]} {
    %c0 = arith.constant 0 : index
    %c0_0 = arith.constant 0 : index
    %0 = vector.load %arg1[%c0, %c0_0] : memref<16x128xf32, #tpu.memory_space<vmem>>, vector<16x128xf32>
    %c0_1 = arith.constant 0 : index
    %c0_2 = arith.constant 0 : index
    %1 = vector.load %arg2[%c0_1, %c0_2] : memref<128x128xf32, #tpu.memory_space<vmem>>, vector<128x128xf32>
    %cst = arith.constant dense<0.000000e+00> : vector<16x128xf32>
    %2 = tpu.matmul %0, %1, %cst {dimension_numbers = #tpu.dot_dimension_numbers<[1], [0], [0], [1], [0, 0, 1, 1], [], []>} : vector<16x128xf32>, vector<128x128xf32>, vector<16x128xf32> -> vector<16x128xf32>
    %c0_3 = arith.constant 0 : index
    %c0_4 = arith.constant 0 : index
    %3 = vector.load %arg3[%c0_3, %c0_4] : memref<1x128xf32, #tpu.memory_space<vmem>>, vector<1x128xf32>
    %4 = vector.broadcast %3 : vector<1x128xf32> to vector<16x128xf32>
    %5 = arith.addf %2, %4 : vector<16x128xf32>
    %6 = arith.addf %5, %0 : vector<16x128xf32>
    %cst_5 = arith.constant 0.000000e+00 : f32
    %7 = vector.broadcast %cst_5 : f32 to vector<16x128xf32>
    %8 = arith.maximumf %6, %7 : vector<16x128xf32>
    %c0_6 = arith.constant 0 : index
    %c0_7 = arith.constant 0 : index
    %9 = vector.load %arg4[%c0_6, %c0_7] : memref<16x128xf32, #tpu.memory_space<vmem>>, vector<16x128xf32>
    tpu.vector_store %arg4[%c0_6, %c0_7], %8 {strides = array<i32>} : memref<16x128xf32, #tpu.memory_space<vmem>>, vector<16x128xf32>,
    return
  }
  func.func @transform_0(%arg0: i32) -> (i32, i32) {
    %c0_i32 = arith.constant 0 : i32
    %c0_i32_0 = arith.constant 0 : i32
    return %arg0, %c0_i32 : i32, i32
  }
  func.func @transform_1(%arg0: i32) -> (i32, i32) {
    %c0_i32 = arith.constant 0 : i32
    %c0_i32_0 = arith.constant 0 : i32
    %c0_i32_1 = arith.constant 0 : i32
    return %c0_i32, %c0_i32_0 : i32, i32
  }
  func.func @transform_2(%arg0: i32) -> (i32, i32) {
    %c0_i32 = arith.constant 0 : i32
    %c0_i32_0 = arith.constant 0 : i32
    %c0_i32_1 = arith.constant 0 : i32
    return %c0_i32, %c0_i32_0 : i32, i32
  }
  func.func @transform_3(%arg0: i32) -> (i32, i32) {
    %c0_i32 = arith.constant 0 : i32
    %c0_i32_0 = arith.constant 0 : i32
    return %arg0, %c0_i32 : i32, i32
  }
}

</mosaic_0001>

<bundles_post_ra>
// kernel: tpu_custom_call.1
= control target key start
LH: loop header
LB: loop body
LE: loop exit
PB: predicated region body
PF: predicated region fallthrough
CT: control target
= control target key end

     0   :  { %8 = vsyncpa [#allocation3], 0  ;;  %s338_s0 = inlined_call_operand.hbm [shape: f32[16,128], index: 0, kind: input, shape index: {}]   ;;  %s339_s1 = inlined_call_operand.hbm [shape: f32[128,128], index: 1, kind: input, shape index: {}]   ;;  %s340_s2 = inlined_call_operand.vmem [shape: f32[1,128], index: 2, kind: input, shape index: {}]   ;;  %s341_s3 = inlined_call_operand.hbm [shape: f32[16,128], index: 3, kind: output, shape index: {}]  }
   0x1   :  { %9 = vsyncpa [#allocation6], 0 }
   0x2   :  { %10 = vsyncpa [#allocation4], 0  ;;  %s292_s12 = smov [#allocation2]  }
   0x3   :  { %s16_s13 = sshll.u32 %s292_s12, 4  ;;  %s17_s13 = int_to_ptr.vmem [resolvable:$true] %s16_s13 }
   0x4   :  { %s234_s14 = scalar_lea.vmem %s17_s13, 256  ;;  %p239_p1 = scmp.lt.s32.totalorder %s17_s13, %s17_s13 }
   0x5   :  { %p235_p0 = scmp.ne.s32.totalorder %s17_s13, %s234_s14  ;;  %p240_p2 = scmp.lt.s32.totalorder %s234_s14, %s234_s14 }
   0x7   :  { %p241_p3 = por %p240_p2, %p239_p1 }
   0x9   :  { %p242_p4 = pnand %p241_p3, %p235_p0 }
   0xb   :  { %245 = shalt.err (!%p242_p4)
}
   0xc   :  { %s293_s15 = smov 128   ;;  %s294_s16 = smov 8  }
   0xd   :  { %22 = dma.hbm_to_vmem [thread:$0]  %s338_s0, 256, %s17_s13, [#allocation3], %s293_s15, %s293_s15, %s294_s16  }
   0xe   :  { %s295_s19 = smov [#allocation5]  }
   0xf   :  { %s28_s20 = sshll.u32 %s295_s19, 4  ;;  %s29_s20 = int_to_ptr.vmem [resolvable:$true] %s28_s20 }
  0x10   :  { %s254_s21 = scalar_lea.vmem %s29_s20, 2048  ;;  %p259_p6 = scmp.lt.s32.totalorder %s29_s20, %s29_s20 }
  0x11   :  { %p255_p5 = scmp.ne.s32.totalorder %s29_s20, %s254_s21  ;;  %p260_p7 = scmp.lt.s32.totalorder %s254_s21, %s254_s21 }
  0x13   :  { %p261_p8 = por %p260_p7, %p259_p6 }
  0x15   :  { %p262_p9 = pnand %p261_p8, %p255_p5 }
  0x17   :  { %265 = shalt.err (!%p262_p9)
}
  0x18   :  { %34 = dma.hbm_to_vmem [thread:$0]  %s339_s1, 2048, %s29_s20, [#allocation6], %s293_s15, %s293_s15, %s294_s16  }
  0x19   :  { %286 = dma.done.wait [#allocation3], 256  }
  0x1a   :  { %287 = vsyncadd [#allocation3], 4294967040 }
  0x1b   :  { %288 = dma.done.wait [#allocation6], 2048  }
  0x1c   :  { %289 = vsyncadd [#allocation6], 4294965248  ;;  %v60_v0 = vld [vmem:[#allocation5 + $0x78] sm:$0xff]  ;;  %v59_v1 = vld [vmem:[#allocation5 + $0x70] sm:$0xff]  ;;  %s296_s24 = smov [#allocation7]  }
  0x1d   :  { %186 = vmatprep.subr.mxu0 %v60_v0  ;;  %v58_v2 = vld [vmem:[#allocation5 + $0x68] sm:$0xff]  ;;  %v57_v3 = vld [vmem:[#allocation5 + $0x60] sm:$0xff]  ;;  %v43_v4 = vld [vmem:[#allocation2] sm:$0xff]  ;;  %s154_s25 = sshll.u32 %s296_s24, 4  ;;  %s155_s25 = int_to_ptr.vmem [resolvable:$true] %s154_s25 }
  0x1e   :  { %187 = vmatpush3.msra.mxu0 %v60_v0  ;;  %v56_v5 = vld [vmem:[#allocation5 + $0x58] sm:$0xff]  ;;  %218 = vmatprep.mubr.f32.mxu0 %v43_v4  ;;  %v55_v6 = vld [vmem:[#allocation5 + $0x50] sm:$0xff]  ;;  %v54_v7 = vld [vmem:[#allocation5 + $0x48] sm:$0xff]  ;;  %s266_s26 = scalar_lea.vmem %s155_s25, 256  ;;  %p271_p11 = scmp.lt.s32.totalorder %s155_s25, %s155_s25 }
  0x1f   :  { %188 = vmatprep.subr.mxu0 %v59_v1  ;;  %v53_v8 = vld [vmem:[#allocation5 + $0x40] sm:$0xff]  ;;  %v52_v9 = vld [vmem:[#allocation5 + $0x38] sm:$0xff]  ;;  %v51_v10 = vld [vmem:[#allocation5 + $0x30] sm:$0xff]  ;;  %p267_p10 = scmp.ne.s32.totalorder %s155_s25, %s266_s26  ;;  %p272_p12 = scmp.lt.s32.totalorder %s266_s26, %s266_s26 }
  0x20   :  { %189 = vmatpush3.msra.mxu0 %v59_v1  ;;  %v50_v11 = vld [vmem:[#allocation5 + $0x28] sm:$0xff]  ;;  %v49_v12 = vld [vmem:[#allocation5 + $0x20] sm:$0xff]  ;;  %v48_v13 = vld [vmem:[#allocation5 + $0x18] sm:$0xff] }
  0x21   :  { %190 = vmatprep.subr.mxu0 %v58_v2  ;;  %v47_v14 = vld [vmem:[#allocation5 + $0x10] sm:$0xff]  ;;  %v46_v15 = vld [vmem:[#allocation5 + $0x8] sm:$0xff]  ;;  %v45_v16 = vld [vmem:[#allocation5] sm:$0xff]  ;;  %p273_p13 = por %p272_p12, %p271_p11 }
  0x22   :  { %191 = vmatpush3.msra.mxu0 %v58_v2  ;;  %v44_v17 = vld [vmem:[#allocation2 + $0x8] sm:$0xff]  ;;  %v167_v18 = vld [vmem:[%s340_s2] ss:$0 sm:$0xff] }
  0x23   :  { %192 = vmatprep.subr.mxu0 %v57_v3  ;;  %p274_p0 = pnand %p273_p13, %p267_p10 }
  0x24   :  { %193 = vmatpush3.msra.mxu0 %v57_v3 }
  0x25   :  { %194 = vmatprep.subr.mxu0 %v56_v5 }
  0x26   :  { %195 = vmatpush3.msra.mxu0 %v56_v5 }
  0x27   :  { %196 = vmatprep.subr.mxu0 %v55_v6 }
  0x28   :  { %197 = vmatpush3.msra.mxu0 %v55_v6 }
  0x29   :  { %198 = vmatprep.subr.mxu0 %v54_v7 }
  0x2a   :  { %199 = vmatpush3.msra.mxu0 %v54_v7 }
  0x2b   :  { %200 = vmatprep.subr.mxu0 %v53_v8 }
  0x2c   :  { %201 = vmatpush3.msra.mxu0 %v53_v8 }
  0x2d   :  { %202 = vmatprep.subr.mxu0 %v52_v9 }
  0x2e   :  { %203 = vmatpush3.msra.mxu0 %v52_v9 }
  0x2f   :  { %204 = vmatprep.subr.mxu0 %v51_v10 }
  0x30   :  { %205 = vmatpush3.msra.mxu0 %v51_v10 }
  0x31   :  { %206 = vmatprep.subr.mxu0 %v50_v11 }
  0x32   :  { %207 = vmatpush3.msra.mxu0 %v50_v11 }
  0x33   :  { %208 = vmatprep.subr.mxu0 %v49_v12 }
  0x34   :  { %209 = vmatpush3.msra.mxu0 %v49_v12 }
  0x35   :  { %210 = vmatprep.subr.mxu0 %v48_v13 }
  0x36   :  { %211 = vmatpush3.msra.mxu0 %v48_v13 }
  0x37   :  { %212 = vmatprep.subr.mxu0 %v47_v14 }
  0x38   :  { %213 = vmatpush3.msra.mxu0 %v47_v14 }
  0x39   :  { %214 = vmatprep.subr.mxu0 %v46_v15 }
  0x3a   :  { %215 = vmatpush3.msra.mxu0 %v46_v15 }
  0x3b   :  { %216 = vmatprep.subr.mxu0 %v45_v16 }
  0x3c   :  { %217 = vmatpush3.msra.mxu0 %v45_v16 }
  0x3d   :  { %219 = vmatmul.mubr.f32.vlgmr.msra.gmra.mxu0 %v44_v17 }
  0xfd   :  { %v220_v19 = vpop.f32.mrf.mxu0 }
  0xfe   :  { %v140_v20 = vadd.f32 %v220_v19, %v167_v18 }
  0xff   :  { %v134_v21 = vpop.f32.mrf.mxu0 }
 0x100   :  { %v144_v22 = vadd.f32 %v140_v20, %v44_v17  ;;  %v135_v23 = vadd.f32 %v167_v18, %v134_v21 }
 0x102   :  { %v146_v24 = vmax.f32 %v144_v22, 0.0  ;;  %v143_v25 = vadd.f32 %v135_v23, %v43_v4 }
 0x104   :  { %148 = vst [vmem:[#allocation7 + $0x8] sm:$0xff] %v146_v24  ;;  %v145_v26 = vmax.f32 %v143_v25, 0.0 }
 0x106   :  { %147 = vst [vmem:[#allocation7] sm:$0xff] %v145_v26 }
 0x107   :  { %277 = shalt.err (!%p274_p0)
}
 0x108   :  { %160 = dma.vmem_to_hbm [thread:$0]  %s155_s25, 256, %s341_s3, [#allocation4], %s293_s15, %s293_s15, %s294_s16  }
 0x109   :  { %290 = dma.done.wait [#allocation4], 256  }
 0x10a   :  { %291 = vsyncadd [#allocation4], 4294967040 }
 0x10b   :  { %164 = vsyncpa [#allocation3], 1 }
 0x10c   :  { %165 = vsyncpa [#allocation6], 1 }
 0x10d   :  { %166 = vsyncpa [#allocation4], 1 }

</bundles_post_ra>
